<compile_context>
chip_gen: v5e
topology: v5e:2x2
jax: 0.10.0
libtpu: 0.0.40
codegen_flags: <defaults>
</compile_context>

<pallas_src>
import jax
import jax.numpy as jnp
from jax import lax
from jax.experimental import pallas as pl
from jax.experimental.pallas import tpu as pltpu


def fixed_hidden_mlp_kernel(x_ref, wt_ref, b_ref, rw_ref, out_ref):
    # Full arrays resident in VMEM; out_ref is a (1, 1) SMEM scalar slot.
    x = x_ref[...]      # (B, 20)  f32
    wt = wt_ref[...]    # (20, 20) f32, already W.T (transposed in the wrapper)
    b = b_ref[...]      # (1, 20)  f32
    rw = rw_ref[...]    # (20, 20) f32

    # X = self.linear(X)
    h = jnp.dot(x, wt, preferred_element_type=jnp.float32) + b
    # X = relu(X @ rand_weight + 1)
    h = jnp.maximum(jnp.dot(h, rw, preferred_element_type=jnp.float32) + 1.0, 0.0)
    # X = self.linear(X)   (shared weights, same W.T / bias tiles)
    h = jnp.dot(h, wt, preferred_element_type=jnp.float32) + b

    # while X.abs().sum() > 1: X /= 2
    # Halving is exact in fp32 (exponent decrement), so carrying the scalars
    # (current_abs_sum, accumulated_scale) on the scalar unit is bit-identical
    # to re-summing the halved tile; trip count == reference trip count.
    abs_sum = jnp.sum(jnp.abs(h))

    def cond(carry):
        s, _ = carry
        return s > jnp.float32(1.0)

    def body(carry):
        s, scale = carry
        return s * jnp.float32(0.5), scale * jnp.float32(0.5)

    _, scale = lax.while_loop(cond, body, (abs_sum, jnp.float32(1.0)))

    # return X.sum()  (after the halvings) -> scalar straight to SMEM.
    out_ref[0, 0] = jnp.sum(h) * scale


@jax.jit
def fixed_hidden_mlp(x, w, b, rand_weight):
    # Hoist the transpose out of the kernel: a one-off (20, 20) XLA op
    # (fused / reusable across calls), so the kernel issues no XLU transposes.
    wt = jnp.asarray(w, jnp.float32).T
    b2d = jnp.asarray(b, jnp.float32).reshape(1, -1)
    out = pl.pallas_call(
        fixed_hidden_mlp_kernel,
        out_shape=jax.ShapeDtypeStruct((1, 1), jnp.float32),
        # Gridless call: whole (tiny) arrays as single VMEM blocks, no
        # pipelining machinery, scalar output on the SMEM path.
        in_specs=[
            pl.BlockSpec(memory_space=pltpu.MemorySpace.VMEM),  # x        (B, 20)
            pl.BlockSpec(memory_space=pltpu.MemorySpace.VMEM),  # W.T      (20, 20)
            pl.BlockSpec(memory_space=pltpu.MemorySpace.VMEM),  # bias     (1, 20)
            pl.BlockSpec(memory_space=pltpu.MemorySpace.VMEM),  # rand_w   (20, 20)
        ],
        out_specs=pl.BlockSpec(memory_space=pltpu.MemorySpace.SMEM),
    )(jnp.asarray(x, jnp.float32), wt, b2d, jnp.asarray(rand_weight, jnp.float32))
    return out[0, 0]


def _reference(x, w, b, rand_weight):
    h = x @ w.T + b
    h = jnp.maximum(h @ rand_weight + 1.0, 0.0)
    h = h @ w.T + b

    def cond(h):
        return jnp.sum(jnp.abs(h)) > 1.0

    def body(h):
        return h / 2.0

    h = lax.while_loop(cond, body, h)
    return jnp.sum(h)


if __name__ == "__main__":
    key = jax.random.PRNGKey(0)
    k_x, k_rw, k_w, k_b = jax.random.split(key, 4)

    # Input consistent with the module: X = torch.rand(2, 20)
    x = jax.random.uniform(k_x, (2, 20), dtype=jnp.float32)

    # Parameters (deterministic, synthetic):
    #   self.rand_weight = torch.rand((20, 20))  -> uniform[0, 1)
    #   self.linear = LazyLinear(20) bound to in_features=20 -> W (20, 20), b (20,)
    rand_weight = jax.random.uniform(k_rw, (20, 20), dtype=jnp.float32)
    bound = 1.0 / jnp.sqrt(20.0)
    w = jax.random.uniform(k_w, (20, 20), minval=-bound, maxval=bound,
                           dtype=jnp.float32)
    b = jax.random.uniform(k_b, (20,), minval=-bound, maxval=bound,
                           dtype=jnp.float32)

    out = fixed_hidden_mlp(x, w, b, rand_weight)
    jax.block_until_ready(out)

    ref = _reference(x, w, b, rand_weight)
    assert jnp.allclose(out, ref, rtol=1e-5, atol=1e-5), (out, ref)

    print("KERNEL_OK")
</pallas_src>

<mosaic_0001>
module attributes {stable_mosaic.version = 11 : i64} {
  func.func @fixed_hidden_mlp_kernel(%arg0: memref<2x20xf32, #tpu.memory_space<vmem>>, %arg1: memref<20x20xf32, #tpu.memory_space<vmem>>, %arg2: memref<1x20xf32, #tpu.memory_space<vmem>>, %arg3: memref<20x20xf32, #tpu.memory_space<vmem>>, %arg4: memref<1x1xf32, #tpu.memory_space<smem>>) attributes {dimension_semantics = [], scalar_prefetch = 0 : i64, scratch_operands = 0 : i64, tpu.core_type = #tpu.core_type<tc>} {
    %c0 = arith.constant 0 : index
    %c0_0 = arith.constant 0 : index
    %0 = vector.load %arg0[%c0, %c0_0] : memref<2x20xf32, #tpu.memory_space<vmem>>, vector<2x20xf32>
    %c0_1 = arith.constant 0 : index
    %c0_2 = arith.constant 0 : index
    %1 = vector.load %arg1[%c0_1, %c0_2] : memref<20x20xf32, #tpu.memory_space<vmem>>, vector<20x20xf32>
    %c0_3 = arith.constant 0 : index
    %c0_4 = arith.constant 0 : index
    %2 = vector.load %arg2[%c0_3, %c0_4] : memref<1x20xf32, #tpu.memory_space<vmem>>, vector<1x20xf32>
    %c0_5 = arith.constant 0 : index
    %c0_6 = arith.constant 0 : index
    %3 = vector.load %arg3[%c0_5, %c0_6] : memref<20x20xf32, #tpu.memory_space<vmem>>, vector<20x20xf32>
    %cst = arith.constant dense<0.000000e+00> : vector<2x20xf32>
    %4 = tpu.matmul %0, %1, %cst {dimension_numbers = #tpu.dot_dimension_numbers<[1], [0], [0], [1], [0, 0, 1, 1], [], []>} : vector<2x20xf32>, vector<20x20xf32>, vector<2x20xf32> -> vector<2x20xf32>
    %5 = vector.broadcast %2 : vector<1x20xf32> to vector<2x20xf32>
    %6 = arith.addf %4, %5 : vector<2x20xf32>
    %cst_7 = arith.constant dense<0.000000e+00> : vector<2x20xf32>
    %7 = tpu.matmul %6, %3, %cst_7 {dimension_numbers = #tpu.dot_dimension_numbers<[1], [0], [0], [1], [0, 0, 1, 1], [], []>} : vector<2x20xf32>, vector<20x20xf32>, vector<2x20xf32> -> vector<2x20xf32>
    %cst_8 = arith.constant 1.000000e+00 : f32
    %8 = vector.broadcast %cst_8 : f32 to vector<2x20xf32>
    %9 = arith.addf %7, %8 : vector<2x20xf32>
    %cst_9 = arith.constant 0.000000e+00 : f32
    %10 = vector.broadcast %cst_9 : f32 to vector<2x20xf32>
    %11 = arith.maximumf %9, %10 : vector<2x20xf32>
    %cst_10 = arith.constant dense<0.000000e+00> : vector<2x20xf32>
    %12 = tpu.matmul %11, %1, %cst_10 {dimension_numbers = #tpu.dot_dimension_numbers<[1], [0], [0], [1], [0, 0, 1, 1], [], []>} : vector<2x20xf32>, vector<20x20xf32>, vector<2x20xf32> -> vector<2x20xf32>
    %13 = vector.broadcast %2 : vector<1x20xf32> to vector<2x20xf32>
    %14 = arith.addf %12, %13 : vector<2x20xf32>
    %15 = math.absf %14 : vector<2x20xf32>
    %16 = vector.shape_cast %15 : vector<2x20xf32> to vector<1x2x20xf32>
    %cst_11 = arith.constant dense<0.000000e+00> : vector<1xf32>
    %17 = vector.multi_reduction <add>, %16, %cst_11 [1, 2] : vector<1x2x20xf32> to vector<1xf32>
    %18 = vector.shape_cast %17 : vector<1xf32> to vector<1x1x1xf32>
    %19 = vector.extract %18[0, 0, 0] : f32 from vector<1x1x1xf32>
    %cst_12 = arith.constant 1.000000e+00 : f32
    %20:2 = scf.while (%arg5 = %19, %arg6 = %cst_12) : (f32, f32) -> (f32, f32) {
      %cst_16 = arith.constant 1.000000e+00 : f32
      %27 = arith.cmpf ogt, %arg5, %cst_16 : f32
      scf.condition(%27) %arg5, %arg6 : f32, f32
    } do {
    ^bb0(%arg5: f32, %arg6: f32):
      %cst_16 = arith.constant 5.000000e-01 : f32
      %27 = arith.mulf %arg5, %cst_16 : f32
      %cst_17 = arith.constant 5.000000e-01 : f32
      %28 = arith.mulf %arg6, %cst_17 : f32
      scf.yield %27, %28 : f32, f32
    }
    %21 = vector.shape_cast %14 : vector<2x20xf32> to vector<1x2x20xf32>
    %cst_13 = arith.constant dense<0.000000e+00> : vector<1xf32>
    %22 = vector.multi_reduction <add>, %21, %cst_13 [1, 2] : vector<1x2x20xf32> to vector<1xf32>
    %23 = vector.shape_cast %22 : vector<1xf32> to vector<1x1x1xf32>
    %24 = vector.extract %23[0, 0, 0] : f32 from vector<1x1x1xf32>
    %25 = arith.mulf %24, %20#1 : f32
    %c0_14 = arith.constant 0 : index
    %c0_15 = arith.constant 0 : index
    %26 = memref.load %arg4[%c0_14, %c0_15] : memref<1x1xf32, #tpu.memory_space<smem>>
    memref.store %25, %arg4[%c0_14, %c0_15] : memref<1x1xf32, #tpu.memory_space<smem>>
    return
  }
}

</mosaic_0001>

<bundles_post_ra>
// kernel: fixed_hidden_mlp.1
= control target key start
LH: loop header
LB: loop body
LE: loop exit
PB: predicated region body
PF: predicated region fallthrough
CT: control target
= control target key end

     0   :  { %9 = vsyncpa [#allocation3], 0  ;;  %vm33_vm0 = vcmask 1043456   ;;  %vm29_vm1 = vcmask 162816   ;;  %vm108_vm2 = vcmask 156672   ;;  %s297_s0 = inlined_call_operand.vmem [shape: f32[2,20], index: 0, kind: input, shape index: {}]   ;;  %s298_s1 = inlined_call_operand.vmem [shape: f32[20,20], index: 1, kind: input, shape index: {}]   ;;  %s299_s2 = inlined_call_operand.vmem [shape: f32[1,20], index: 2, kind: input, shape index: {}]   ;;  %s300_s3 = inlined_call_operand.vmem [shape: f32[20,20], index: 3, kind: input, shape index: {}]   ;;  %s301_s4 = inlined_call_operand.hbm [shape: f32[1,1], index: 4, kind: output, shape index: {}]  }
   0x1   :  { %v21_v0 = vld [vmem:[%s298_s1 + $0x10] sm:$0xf]  ;;  %v20_v1 = vld [vmem:[%s298_s1 + $0x8] sm:$0xff]  ;;  %v19_v3 = vld [vmem:[%s298_s1] sm:$0xff] }
   0x2   :  { %165 = vmatpush.msk.msra.mxu0 %vm33_vm0, %v21_v0  ;;  %v25_v2 = vld [vmem:[%s300_s3 + $0x10] sm:$0xf]  ;;  %169 = vmatpush.msk.msra.mxu2 %vm33_vm0, %v21_v0  ;;  %v18_v4 = vld [vmem:[%s297_s0] sm:$0x3]  ;;  %v24_v5 = vld [vmem:[%s300_s3 + $0x8] sm:$0xff] }
   0x3   :  { %167 = vmatpush.msk.msra.mxu1 %vm33_vm0, %v25_v2  ;;  %v23_v6 = vld [vmem:[%s300_s3] sm:$0xff] }
   0x4   :  { %51 = vmatpush.msra.mxu0 %v20_v1  ;;  %101 = vmatpush.msra.mxu2 %v20_v1  ;;  %v200_v7 = vld [vmem:[%s299_s2] ss:$0 sm:$0xff]  ;;  %s235_s2 = smov 1.0  }
   0x5   :  { %77 = vmatpush.msra.mxu1 %v24_v5 }
   0x6   :  { %52 = vmatpush.msra.mxu0 %v19_v3  ;;  %102 = vmatpush.msra.mxu2 %v19_v3 }
   0x7   :  { %166 = vmatmul.msk.f32.vlgmr.msra.gmra.mxu0 %vm29_vm1, %v18_v4  ;;  %78 = vmatpush.msra.mxu1 %v23_v6 }
  0x84   :  { %v54_v8 = vpop.f32.mrf.mxu0 }
  0x85   :  { %v55_v9 = vadd.f32 %v200_v7, %v54_v8 }
  0x87   :  { %168 = vmatmul.msk.f32.vlgmr.msra.gmra.mxu1 %vm29_vm1, %v55_v9 }
 0x104   :  { %v80_v10 = vpop.f32.mrf.mxu1 }
 0x105   :  { %v81_v11 = vadd.f32 1.0, %v80_v10 }
 0x107   :  { %v83_v12 = vmax.f32 %v81_v11, 0.0 }
 0x109   :  { %170 = vmatmul.msk.f32.vlgmr.msra.gmra.mxu2 %vm29_vm1, %v83_v12 }
 0x18c   :  { %v104_v13 = vpop.f32.mrf.mxu2 }
 0x18d   :  { %v105_v14 = vadd.f32 %v200_v7, %v104_v13 }
 0x18f   :  { %v107_v15 = vand.u32 2147483647, %v105_v14 }
 0x191   :  { %v109_v16 = vsel %vm108_vm2, %v107_v15, 0.0 }
 0x192   :  { %110 = vadd.xlane.f32.xlu0 %v109_v16 }
 0x205   :  { %v111_v17 = vpop.xlane.xlu0 %110 }
 0x206   :  { %v112_v18 = vrot.slane %v111_v17, 4 }
 0x208   :  { %v113_v19 = vadd.f32 %v112_v18, %v111_v17 }
 0x20a   :  { %v114_v20 = vrot.slane %v113_v19, 2 }
 0x20c   :  { %v115_v21 = vadd.f32 %v114_v20, %v113_v19 }
 0x20e   :  { %v116_v22 = vrot.slane %v115_v21, 1 }
 0x210   :  { %v117_v23 = vadd.f32 %v116_v22, %v115_v21 }
 0x212   :  { %171 = vpush %v117_v23 }
 0x243   :  { %s172_s0 = spop %171  }
 0x244   :  { %p158_p0 = scmp.gt.f32.partialorder %s172_s0, 1.0 }
 0x245   :  { %s227_s3 = smov (%p158_p0), 1.0   ;;  %s231_s30 = smov (%p158_p0), %s172_s0  }
 0x246   :  { %160 = sbr.rel (!%p158_p0) target bundleno = 596 (0x254), region = 38 }
 0x24b LB: > { %s126_s30 = smul.f32 0.5, %s233_s30   ;;  %s233_s30 = sphi %s231_s30, %s126_s30   ;;  %s229_s3 = sphi %s227_s3, %s228_s3  }
 0x24c   : > { %s127_s5 = smul.f32 0.5, %s229_s3  }
 0x24d   : > { %p122_p1 = scmp.gt.f32.partialorder %s126_s30, 1.0 }
 0x24e   : > { %s228_s3 = smov %s127_s5   ;;  %s236_s2 = smov (!%p122_p1), %s127_s5  }
 0x24f   :  { %125 = sbr.rel (%p122_p1) target bundleno = 587 (0x24b), region = 44 }
 0x254 PF:  { %v128_v24 = vsel %vm108_vm2, %v105_v14, 0.0  ;;  %s146_s8 = sshll.u32 %s301_s4, 4  ;;  %s239_s11 = smov [#allocation2]   ;;  %s237_s2 = sphi %s235_s2, %s236_s2   ;;  %s147_s8 = int_to_ptr.hbm [resolvable:$true] %s146_s8 }
 0x255   :  { %129 = vadd.xlane.f32.xlu0 %v128_v24 }
 0x2c8   :  { %v130_v25 = vpop.xlane.xlu0 %129 }
 0x2c9   :  { %v131_v26 = vrot.slane %v130_v25, 4 }
 0x2cb   :  { %v132_v27 = vadd.f32 %v131_v26, %v130_v25 }
 0x2cd   :  { %v133_v28 = vrot.slane %v132_v27, 2 }
 0x2cf   :  { %v134_v29 = vadd.f32 %v133_v28, %v132_v27 }
 0x2d1   :  { %v135_v30 = vrot.slane %v134_v29, 1 }
 0x2d3   :  { %v136_v31 = vadd.f32 %v135_v30, %v134_v29 }
 0x2d5   :  { %173 = vpush %v136_v31 }
 0x306   :  { %s174_s9 = spop %173 }
 0x307   :  { %s138_s10 = smul.f32 %s237_s2, %s174_s9 }
 0x309   :  { %140 = sst [smem:[#allocation2]] %s138_s10 }
 0x30a   :  { %149 = dma.smem_to_hbm %s239_s11, 16, %s147_s8, [#allocation3]  }
 0x30b   :  { %225 = dma.done.wait [#allocation3], 16  }
 0x30c   :  { %226 = vsyncadd [#allocation3], 4294967280 }
 0x30d   :  { %154 = sfence }
 0x30e   :  { %155 = vsyncpa [#allocation3], 1 }

</bundles_post_ra>
